<compile_context>
chip_gen: v5e
topology: v5e:2x2
jax: 0.10.0
libtpu: 0.0.40
codegen_flags: <defaults>
</compile_context>

<pallas_src>
import jax
import jax.numpy as jnp
from jax.experimental import pallas as pl
from jax.experimental.pallas import tpu as pltpu

SIZE = 32                     # "size" argument of the module
N_MED = 3
INPUT_SIZE = SIZE + N_MED     # 35
HIDDEN = 64
H_PAD = 128                   # lane-dense hidden width (cols 64..127 are zero)

# Packed parameter slab layout (rows x H_PAD), packed once at init:
#   rows 0 .. SIZE-1        : W1 rows for the x features
#   rows SIZE .. SIZE+2     : W1 rows for the 3 medical features
#   row  ROW_B1             : b1
#   row  ROW_W2             : w2^T (lane-dense)
ROW_MD0 = SIZE                # 32
ROW_B1 = INPUT_SIZE           # 35
ROW_W2 = INPUT_SIZE + 1       # 36
SLAB_ROWS = INPUT_SIZE + 2    # 37

assert INPUT_SIZE == SIZE + N_MED
assert HIDDEN <= H_PAD


def mlp_head_kernel(x_ref, md_ref, p_ref, b2_ref, o_ref):
    # x_ref : (1, SIZE) f32, VMEM
    # md_ref: (N_MED,)  f32, SMEM  (scalar reads)
    # p_ref : (SLAB_ROWS, H_PAD) f32, VMEM  (packed parameters)
    # b2_ref: (1,) f32, SMEM
    # o_ref : (1, 1) f32, VMEM
    x = x_ref[...]                                   # (1, SIZE)

    # Layer 1: MXU matmul over the 32 x-features; the 3 medical features and b1
    # are folded in as SMEM-scalar * slab-row VPU adds (free VALU slots).
    h = jnp.dot(x, p_ref[0:SIZE, :], preferred_element_type=jnp.float32)  # (1, H_PAD)
    h = h + md_ref[0] * p_ref[ROW_MD0 + 0:ROW_MD0 + 1, :]
    h = h + md_ref[1] * p_ref[ROW_MD0 + 1:ROW_MD0 + 2, :]
    h = h + md_ref[2] * p_ref[ROW_MD0 + 2:ROW_MD0 + 3, :]
    h = h + p_ref[ROW_B1:ROW_B1 + 1, :]
    h = jnp.maximum(h, 0.0)                          # padded lanes stay 0

    # Layer 2: VPU multiply + cross-lane reduce (no 1-wide MXU matmul);
    # b2 comes from SMEM as a scalar add.
    w2_row = p_ref[ROW_W2:ROW_W2 + 1, :]             # (1, H_PAD), zero past col 63
    o = jnp.sum(h * w2_row, axis=-1, keepdims=True) + b2_ref[0]
    o_ref[...] = o.astype(o_ref.dtype)


def pack_params(w1, b1, w2, b2):
    """Pack (w1, b1, w2) into one (SLAB_ROWS, H_PAD) f32 slab + b2 as a (1,) SMEM scalar.
    Do this ONCE at init, outside the hot path."""
    slab = jnp.zeros((SLAB_ROWS, H_PAD), jnp.float32)
    slab = slab.at[0:INPUT_SIZE, 0:HIDDEN].set(w1.astype(jnp.float32))   # W1 rows
    slab = slab.at[ROW_B1, 0:HIDDEN].set(b1.astype(jnp.float32))         # b1 row
    slab = slab.at[ROW_W2, 0:HIDDEN].set(w2[:, 0].astype(jnp.float32))   # w2^T row
    b2_param = b2.astype(jnp.float32).reshape(1)
    return slab, b2_param


_FLOPS = 2 * SIZE * H_PAD + 10 * H_PAD               # matmul + scalar-row adds + reduce
_BYTES = (SLAB_ROWS * H_PAD + SIZE + N_MED + 1 + 1) * 4


@jax.jit
def fully_connected_head(x, medical_data, param_slab, b2_param):
    """x: (SIZE,) f32, medical_data: (3,) f32, packed params -> (1,) f32"""
    x2d = x.astype(jnp.float32).reshape(1, SIZE)      # free layout op, no concat/pad HLOs
    md = medical_data.astype(jnp.float32).reshape(N_MED)

    out = pl.pallas_call(
        mlp_head_kernel,
        out_shape=jax.ShapeDtypeStruct((1, 1), jnp.float32),
        in_specs=[
            pl.BlockSpec(memory_space=pltpu.MemorySpace.VMEM),   # x, whole array
            pl.BlockSpec(memory_space=pltpu.MemorySpace.SMEM),   # medical scalars
            pl.BlockSpec(memory_space=pltpu.MemorySpace.VMEM),   # packed params
            pl.BlockSpec(memory_space=pltpu.MemorySpace.SMEM),   # b2 scalar
        ],
        out_specs=pl.BlockSpec(memory_space=pltpu.MemorySpace.VMEM),
        cost_estimate=pl.CostEstimate(
            flops=_FLOPS, transcendentals=0, bytes_accessed=_BYTES),
    )(x2d, md, param_slab, b2_param)

    return out.reshape(1)  # matches torch output shape (1,)


def init_params(key):
    """nn.Linear-style init (uniform +-1/sqrt(fan_in)), matching PyTorch shapes."""
    k1, k2, k3, k4 = jax.random.split(key, 4)
    bound1 = 1.0 / jnp.sqrt(INPUT_SIZE)
    bound2 = 1.0 / jnp.sqrt(HIDDEN)
    w1 = jax.random.uniform(k1, (INPUT_SIZE, HIDDEN), jnp.float32, -bound1, bound1)
    b1 = jax.random.uniform(k2, (HIDDEN,), jnp.float32, -bound1, bound1)
    w2 = jax.random.uniform(k3, (HIDDEN, 1), jnp.float32, -bound2, bound2)
    b2 = jax.random.uniform(k4, (1,), jnp.float32, -bound2, bound2)
    return w1, b1, w2, b2


if __name__ == "__main__":
    key = jax.random.PRNGKey(0)
    kp, kx, km = jax.random.split(key, 3)
    w1, b1, w2, b2 = init_params(kp)
    param_slab, b2_param = pack_params(w1, b1, w2, b2)   # done once, outside the hot path

    x = jax.random.normal(kx, (SIZE,), jnp.float32)
    medical_data = jax.random.normal(km, (N_MED,), jnp.float32)

    out = jax.block_until_ready(
        fully_connected_head(x, medical_data, param_slab, b2_param))

    # Pure-JAX reference check (same semantics as the PyTorch module).
    feat = jnp.concatenate([x, medical_data])
    ref = jnp.maximum(feat @ w1 + b1, 0.0) @ w2 + b2
    assert out.shape == (1,)
    assert jnp.allclose(out, ref, atol=1e-5), (out, ref)

    print("KERNEL_OK")
</pallas_src>

<mosaic_0001>
module attributes {stable_mosaic.version = 11 : i64} {
  func.func @mlp_head_kernel(%arg0: memref<1x32xf32, #tpu.memory_space<vmem>>, %arg1: memref<3xf32, #tpu.memory_space<smem>>, %arg2: memref<37x128xf32, #tpu.memory_space<vmem>>, %arg3: memref<1xf32, #tpu.memory_space<smem>>, %arg4: memref<1x1xf32, #tpu.memory_space<vmem>>) attributes {dimension_semantics = [], scalar_prefetch = 0 : i64, scratch_operands = 0 : i64, tpu.core_type = #tpu.core_type<tc>} {
    %c0 = arith.constant 0 : index
    %c0_0 = arith.constant 0 : index
    %0 = vector.load %arg0[%c0, %c0_0] : memref<1x32xf32, #tpu.memory_space<vmem>>, vector<1x32xf32>
    %c0_1 = arith.constant 0 : index
    %c0_2 = arith.constant 0 : index
    %1 = vector.load %arg2[%c0_1, %c0_2] : memref<37x128xf32, #tpu.memory_space<vmem>>, vector<32x128xf32>
    %cst = arith.constant dense<0.000000e+00> : vector<1x128xf32>
    %2 = tpu.matmul %0, %1, %cst {dimension_numbers = #tpu.dot_dimension_numbers<[1], [0], [0], [1], [0, 0, 1, 1], [], []>} : vector<1x32xf32>, vector<32x128xf32>, vector<1x128xf32> -> vector<1x128xf32>
    %c0_3 = arith.constant 0 : index
    %3 = memref.load %arg1[%c0_3] : memref<3xf32, #tpu.memory_space<smem>>
    %c32 = arith.constant 32 : index
    %c0_4 = arith.constant 0 : index
    %4 = vector.load %arg2[%c32, %c0_4] : memref<37x128xf32, #tpu.memory_space<vmem>>, vector<1x128xf32>
    %5 = vector.broadcast %3 : f32 to vector<1x128xf32>
    %6 = arith.mulf %5, %4 : vector<1x128xf32>
    %7 = arith.addf %2, %6 : vector<1x128xf32>
    %c1 = arith.constant 1 : index
    %8 = memref.load %arg1[%c1] : memref<3xf32, #tpu.memory_space<smem>>
    %c33 = arith.constant 33 : index
    %c0_5 = arith.constant 0 : index
    %9 = vector.load %arg2[%c33, %c0_5] : memref<37x128xf32, #tpu.memory_space<vmem>>, vector<1x128xf32>
    %10 = vector.broadcast %8 : f32 to vector<1x128xf32>
    %11 = arith.mulf %10, %9 : vector<1x128xf32>
    %12 = arith.addf %7, %11 : vector<1x128xf32>
    %c2 = arith.constant 2 : index
    %13 = memref.load %arg1[%c2] : memref<3xf32, #tpu.memory_space<smem>>
    %c34 = arith.constant 34 : index
    %c0_6 = arith.constant 0 : index
    %14 = vector.load %arg2[%c34, %c0_6] : memref<37x128xf32, #tpu.memory_space<vmem>>, vector<1x128xf32>
    %15 = vector.broadcast %13 : f32 to vector<1x128xf32>
    %16 = arith.mulf %15, %14 : vector<1x128xf32>
    %17 = arith.addf %12, %16 : vector<1x128xf32>
    %c35 = arith.constant 35 : index
    %c0_7 = arith.constant 0 : index
    %18 = vector.load %arg2[%c35, %c0_7] : memref<37x128xf32, #tpu.memory_space<vmem>>, vector<1x128xf32>
    %19 = arith.addf %17, %18 : vector<1x128xf32>
    %cst_8 = arith.constant 0.000000e+00 : f32
    %20 = vector.broadcast %cst_8 : f32 to vector<1x128xf32>
    %21 = arith.maximumf %19, %20 : vector<1x128xf32>
    %c36 = arith.constant 36 : index
    %c0_9 = arith.constant 0 : index
    %22 = vector.load %arg2[%c36, %c0_9] : memref<37x128xf32, #tpu.memory_space<vmem>>, vector<1x128xf32>
    %23 = arith.mulf %21, %22 : vector<1x128xf32>
    %cst_10 = arith.constant dense<0.000000e+00> : vector<1xf32>
    %24 = vector.multi_reduction <add>, %23, %cst_10 [1] : vector<1x128xf32> to vector<1xf32>
    %25 = vector.shape_cast %24 : vector<1xf32> to vector<1x1xf32>
    %c0_11 = arith.constant 0 : index
    %26 = memref.load %arg3[%c0_11] : memref<1xf32, #tpu.memory_space<smem>>
    %27 = vector.broadcast %26 : f32 to vector<1x1xf32>
    %28 = arith.addf %25, %27 : vector<1x1xf32>
    %c0_12 = arith.constant 0 : index
    %c0_13 = arith.constant 0 : index
    %29 = vector.load %arg4[%c0_12, %c0_13] : memref<1x1xf32, #tpu.memory_space<vmem>>, vector<1x1xf32>
    tpu.vector_store %arg4[%c0_12, %c0_13], %28 {strides = array<i32>} : memref<1x1xf32, #tpu.memory_space<vmem>>, vector<1x1xf32>,
    return
  }
}

</mosaic_0001>

<bundles_post_ra>
// kernel: fully_connected_head.1
= control target key start
LH: loop header
LB: loop body
LE: loop exit
PB: predicated region body
PF: predicated region fallthrough
CT: control target
= control target key end

     0   :  { %10 = vsyncpa [#allocation6], 0  ;;  %s242_s0 = inlined_call_operand.vmem [shape: f32[1,32], index: 0, kind: input, shape index: {}]   ;;  %s243_s1 = inlined_call_operand.vmem [shape: f32[3], index: 1, kind: input, shape index: {}]   ;;  %s244_s2 = inlined_call_operand.hbm [shape: f32[37,128], index: 2, kind: input, shape index: {}]   ;;  %s245_s3 = inlined_call_operand.<no memory space> [shape: f32[1], index: 3, kind: input, shape index: {}]   ;;  %s246_s4 = inlined_call_operand.hbm [shape: f32[1,1], index: 4, kind: output, shape index: {}]  }
   0x1   :  { %11 = vsyncpa [#allocation4], 0 }
   0x2   :  { %12 = vsyncpa [#allocation5], 0  ;;  %s20_s17 = sshll.u32 %s243_s1, 4  ;;  %s28_s20 = sshll.u32 %s244_s2, 4  ;;  %s21_s17 = int_to_ptr.vmem [resolvable:$true] %s20_s17  ;;  %s29_s20 = int_to_ptr.hbm [resolvable:$true] %s28_s20 }
   0x3   :  { %s197_s21 = smov [#allocation3]   ;;  %s198_s22 = smov [#allocation7]  }
   0x4   :  { %23 = dma.vmem_to_smem %s21_s17, 16, %s197_s21, [#allocation6]  }
   0x5   :  { %s30_s23 = sshll.u32 %s198_s22, 4  ;;  %s199_s24 = smov 128   ;;  %s31_s23 = int_to_ptr.vmem [resolvable:$true] %s30_s23 }
   0x6   :  { %s200_s25 = smov 8  }
   0x7   :  { %36 = dma.hbm_to_vmem [thread:$0]  %s29_s20, 640, %s31_s23, [#allocation4], %s199_s24, %s199_s24, %s200_s25  }
   0x8   :  { %191 = dma.done.wait [#allocation6], 16  }
   0x9   :  { %192 = vsyncadd [#allocation6], 4294967280 }
   0xa   :  { %193 = dma.done.wait [#allocation4], 640  }
   0xb   :  { %194 = vsyncadd [#allocation4], 4294966656 }
   0xc   :  { %47 = sfence }
   0xd   :  { %v52_v0 = vld [vmem:[#allocation7 + $0x18] sm:$0xff]  ;;  %v51_v1 = vld [vmem:[#allocation7 + $0x10] sm:$0xff]  ;;  %v50_v2 = vld [vmem:[#allocation7 + $0x8] sm:$0xff]  ;;  %vm57_vm0 = vcmask 261120   ;;  %s53_s26 = sld [smem:[#allocation3]]  ;;  %vm96_vm1 = vcmask 1040384   ;;  %v101_v24 = vstv %s245_s3 }
   0xe   :  { %73 = vmatpush.msra.mxu0 %v52_v0  ;;  %v49_v3 = vld [vmem:[#allocation7] sm:$0xff]  ;;  %s124_s27 = sld [smem:[#allocation3 + $0x1]]  ;;  %s201_s30 = smov [#allocation8]   ;;  %vm103_vm2 = vcmask 0  }
   0xf   :  { %v48_v4 = vld [vmem:[%s242_s0] sm:$0x1]  ;;  %s125_s28 = sld [smem:[#allocation3 + $0x2]]  ;;  %v82_v7 = vld [vmem:[#allocation7 + $0x21] sm:$0x1]  ;;  %s110_s5 = sshll.u32 %s201_s30, 4  ;;  %s111_s5 = int_to_ptr.vmem [resolvable:$true] %s110_s5 }
  0x10   :  { %74 = vmatpush.msra.mxu0 %v51_v1  ;;  %v54_v5 = vld [vmem:[#allocation7 + $0x20] sm:$0x1]  ;;  %v87_v10 = vld [vmem:[#allocation7 + $0x22] sm:$0x1]  ;;  %v91_v17 = vld [vmem:[#allocation7 + $0x23] sm:$0x1] }
  0x11   :  { %v94_v20 = vld [vmem:[#allocation7 + $0x24] sm:$0x1]  ;;  %s112_s8 = sshll.u32 %s246_s4, 4  ;;  %s113_s8 = int_to_ptr.hbm [resolvable:$true] %s112_s8 }
  0x12   :  { %75 = vmatpush.msra.mxu0 %v50_v2 }
  0x13   :  { %v55_v6 = vstv %s53_s26 }
  0x14   :  { %76 = vmatpush.msra.mxu0 %v49_v3  ;;  %v83_v8 = vstv %s124_s27  ;;  %v56_v9 = vmul.f32 %v55_v6, %v54_v5 }
  0x15   :  { %123 = vmatmul.msk.f32.vlgmr.msra.gmra.mxu0 %vm57_vm0, %v48_v4  ;;  %v88_v11 = vstv %s125_s28  ;;  %v84_v12 = vmul.f32 %v83_v8, %v82_v7 }
  0x16   :  { %v89_v15 = vmul.f32 %v88_v11, %v87_v10 }
  0x92   :  { %v78_v13 = vpop.f32.mrf.mxu0 }
  0x93   :  { %v79_v14 = vadd.f32 %v78_v13, %v56_v9 }
  0x95   :  { %v85_v16 = vadd.f32 %v84_v12, %v79_v14 }
  0x97   :  { %v90_v18 = vadd.f32 %v89_v15, %v85_v16 }
  0x99   :  { %v92_v19 = vadd.f32 %v91_v17, %v90_v18 }
  0x9b   :  { %v93_v21 = vmax.f32 %v92_v19, 0.0 }
  0x9d   :  { %v95_v22 = vmul.f32 %v94_v20, %v93_v21 }
  0x9f   :  { %v97_v23 = vsel %vm96_vm1, %v95_v22, 0.0 }
  0xa0   :  { %98 = vadd.xlane.f32.xlu0 %v97_v23 }
 0x113   :  { %v99_v25 = vpop.xlane.xlu0 %98 }
 0x114   :  { %v102_v26 = vadd.f32 %v101_v24, %v99_v25 }
 0x116   :  { %104 = vst.msk [vmem:[#allocation8] sm:$0x1] %vm103_vm2, %v102_v26 }
 0x117   :  { %115 = dma.vmem_to_hbm [thread:$0]  %s111_s5, 16, %s113_s8, [#allocation5]  }
 0x118   :  { %195 = dma.done.wait [#allocation5], 16  }
 0x119   :  { %196 = vsyncadd [#allocation5], 4294967280 }
 0x11a   :  { %120 = vsyncpa [#allocation4], 1 }
 0x11b   :  { %121 = vsyncpa [#allocation5], 1 }
 0x11c   :  { %122 = vsyncpa [#allocation6], 1 }

</bundles_post_ra>
